<compile_context>
chip_gen: v5e
topology: v5e:2x2
jax: 0.10.0
libtpu: 0.0.40
codegen_flags: <defaults>
</compile_context>

<pallas_src>
import functools

import jax
import jax.numpy as jnp
from jax.experimental import pallas as pl
from jax.experimental.pallas import tpu as pltpu

EPS = 1e-5  # nn.InstanceNorm2d default eps


def _vmem_limit_bytes(cin, cout, spatial):
    """Scoped-VMEM budget from the per-step footprint: double-buffered I/O
    blocks + resident weights + in-kernel roll/tap/acc temporaries."""
    act_in = cin * spatial * 4
    act_out = cout * spatial * 4
    weights = (9 * cin * cout + 9 * cout * cout + 2 * cout) * 4
    need = (2 * act_in + 2 * act_out + 2 * weights
            + 14 * max(act_in, act_out) + (2 << 20))
    try:
        cap = pltpu.get_tpu_info().vmem_capacity_bytes
    except Exception:  # hardware query only; never guards kernel execution
        cap = 64 * 1024 * 1024
    return int(min(max(need, 32 * 1024 * 1024), cap * 9 // 10))


def _fused_resblock_kernel(x_ref, w1_ref, b1_ref, w2_ref, b2_ref, o_ref, *, H, W):
    """x_ref/o_ref: (1, C, S) with S = H*W on lanes; w*_ref: (9, Cout, Cin)
    (tap-major); b*_ref: (Cout, 1)."""
    S = H * W
    C = x_ref.shape[1]
    x = x_ref[0]                                           # (C, S) f32

    # Border masks over the flattened spatial axis (shared by both convs).
    lane = jax.lax.broadcasted_iota(jnp.int32, (C, S), 1)
    if (W & (W - 1)) == 0:
        col = lane & (W - 1)
    else:
        col = lane % W
    w_first = col == 0
    w_last = col == (W - 1)
    h_first = lane < W
    h_last = lane >= (S - W)

    def conv3x3_reflect_inorm(a, w_ref, b_ref):
        """ReflectionPad2d(1) + 3x3 conv + bias + InstanceNorm on (Cin, S)."""
        cout = w_ref.shape[1]
        # W-direction reflected shifts: XLU lane rolls + border fix.
        a_m1 = pltpu.roll(a, 1, 1)        # value from flat index i-1  (w-1)
        a_p1 = pltpu.roll(a, S - 1, 1)    # value from flat index i+1  (w+1)
        bx = {-1: jnp.where(w_first, a_p1, a_m1),
              0: a,
              1: jnp.where(w_last, a_m1, a_p1)}
        acc = jnp.zeros((cout, S), jnp.float32)
        for dx in range(3):
            b = bx[dx - 1]
            b_up = pltpu.roll(b, W, 1)       # value from row h-1
            b_dn = pltpu.roll(b, S - W, 1)   # value from row h+1
            taps = {-1: jnp.where(h_first, b_dn, b_up),
                    0: b,
                    1: jnp.where(h_last, b_up, b_dn)}
            for dy in range(3):
                k = dy * 3 + dx
                # Transposed matmul: (Cout, Cin) @ (Cin, S); S fills the MXU
                # lane/N dim.  Operands kept f32 (v5e-native, comfortably
                # inside the 1e-3 check); on v6e/v7x bf16 operands with f32
                # accumulation would ~2x MXU throughput if tolerance allows.
                acc = acc + jnp.dot(w_ref[k], taps[dy - 1],
                                    preferred_element_type=jnp.float32)
        y = acc + b_ref[...]
        # One-pass InstanceNorm over the spatial (lane) axis, per channel.
        inv_s = 1.0 / S
        mean = jnp.sum(y, axis=1, keepdims=True) * inv_s
        var = jnp.sum(y * y, axis=1, keepdims=True) * inv_s - mean * mean
        return (y - mean) * jax.lax.rsqrt(var + EPS)

    # block1: pad -> conv -> InstanceNorm -> ReLU
    r = jnp.maximum(conv3x3_reflect_inorm(x, w1_ref, b1_ref), 0.0)
    # TODO(synk): self.shortcut = nn.Dropout(0.5) is modeled as inference-mode
    # identity (normalize_dropout=False => no rescale); training-mode random
    # masking and InstanceNorm's track_running_stats buffers are not emulated.

    # block2: pad -> conv -> InstanceNorm, then residual add (apply_res_act=False).
    z = conv3x3_reflect_inorm(r, w2_ref, b2_ref)
    o_ref[0] = (x + z).astype(o_ref.dtype)


def _resblock_flat_call(x_ncs, w1, b1, w2, b2, H, W):
    """One fused ResBlock on the internal lane-dense (N, C, H*W) layout."""
    N, C, S = x_ncs.shape
    cout = w1.shape[1]
    assert w1.shape == (9, cout, C) and w2.shape == (9, cout, cout)
    assert cout == C, "ResBlock requires in_channels == out_channels"
    # TODO(synk): for spatial maps whose per-image (C, H*W) f32 slab does not
    # fit VMEM alongside temporaries, add an H-row tile grid axis with a 1-row
    # halo and a two-pass InstanceNorm; GridNet's 64x64x256 maps fit as-is.
    return pl.pallas_call(
        functools.partial(_fused_resblock_kernel, H=H, W=W),
        out_shape=jax.ShapeDtypeStruct((N, C, S), jnp.float32),
        grid_spec=pltpu.PrefetchScalarGridSpec(
            num_scalar_prefetch=0,
            grid=(N,),                      # nb=1: megacore via grid on v7x
            in_specs=[
                pl.BlockSpec((1, C, S), lambda n: (n, 0, 0)),
                pl.BlockSpec((9, C, C), lambda n: (0, 0, 0)),
                pl.BlockSpec((C, 1), lambda n: (0, 0)),
                pl.BlockSpec((9, C, C), lambda n: (0, 0, 0)),
                pl.BlockSpec((C, 1), lambda n: (0, 0)),
            ],
            out_specs=pl.BlockSpec((1, C, S), lambda n: (n, 0, 0)),
        ),
        compiler_params=pltpu.CompilerParams(
            dimension_semantics=("parallel",),
            vmem_limit_bytes=_vmem_limit_bytes(C, cout, S),
        ),
    )(x_ncs.astype(jnp.float32), w1.astype(jnp.float32),
      b1.reshape(cout, 1).astype(jnp.float32),
      w2.astype(jnp.float32), b2.reshape(cout, 1).astype(jnp.float32))


@jax.jit
def resblock_forward(x_nchw, w1, b1, w2, b2):
    """Single ResBlock, NCHW in / NCHW out.  NCHW <-> (N,C,H*W) is a pure
    reshape (no transpose), so layout conversion costs nothing."""
    N, C, H, W = x_nchw.shape
    y = _resblock_flat_call(x_nchw.reshape(N, C, H * W), w1, b1, w2, b2, H, W)
    return y.reshape(N, C, H, W)


@jax.jit
def resblock_stack_forward(x_nchw, params):
    """Stacked ResBlocks (GridNet's `self.res`) chained in the internal
    (N, C, H*W) layout with zero wrapper relayouts between blocks."""
    N, C, H, W = x_nchw.shape
    a = x_nchw.reshape(N, C, H * W)
    for (w1, b1, w2, b2) in params:
        a = _resblock_flat_call(a, w1, b1, w2, b2, H, W)
    return a.reshape(N, C, H, W)


# ----------------------------- params / reference ----------------------------
def init_params(key, cin, cout):
    """ConvBlock params: conv.weight ~ N(0, 0.02) (init_para=True), conv.bias
    ~ U(+-1/sqrt(fan_in)).  Weights stored tap-major as (9, Cout, Cin)
    (PyTorch (Cout, Cin, 3, 3) permuted to (kh*kw, Cout, Cin))."""
    k1, k2, k3, k4 = jax.random.split(key, 4)
    w1 = 0.02 * jax.random.normal(k1, (9, cout, cin), jnp.float32)
    w2 = 0.02 * jax.random.normal(k2, (9, cout, cout), jnp.float32)
    bd1 = 1.0 / (cin * 9) ** 0.5
    bd2 = 1.0 / (cout * 9) ** 0.5
    b1 = jax.random.uniform(k3, (cout,), jnp.float32, -bd1, bd1)
    b2 = jax.random.uniform(k4, (cout,), jnp.float32, -bd2, bd2)
    return w1, b1, w2, b2


def _ref_resblock(x_nchw, w1, b1, w2, b2):
    """Pure-JAX (XLA conv) reference for correctness checks."""
    x = jnp.transpose(x_nchw, (0, 2, 3, 1)).astype(jnp.float32)
    pad = lambda a: jnp.pad(a, ((0, 0), (1, 1), (1, 1), (0, 0)), mode="reflect")

    def cb(a, w, b, act):
        cout, cin = w.shape[1], w.shape[2]
        hwio = jnp.transpose(w.reshape(3, 3, cout, cin), (0, 1, 3, 2))
        y = jax.lax.conv_general_dilated(
            pad(a), hwio, window_strides=(1, 1), padding="VALID",
            dimension_numbers=("NHWC", "HWIO", "NHWC")) + b.reshape(1, 1, 1, -1)
        mean = jnp.mean(y, axis=(1, 2), keepdims=True)
        var = jnp.mean((y - mean) ** 2, axis=(1, 2), keepdims=True)
        y = (y - mean) * jax.lax.rsqrt(var + EPS)
        return jnp.maximum(y, 0.0) if act else y

    r = cb(x, w1, b1, True)
    out = x + cb(r, w2, b2, False)
    return jnp.transpose(out, (0, 3, 1, 2))


# TODO(synk): GridNet's surrounding stages (7x7 stem, strided downsample convs,
# conv4/conv5 stacks, tanh output heads) are standard convolutions not
# kernelized here; this kernel implements the ResBlock unit repeated 9x.

if __name__ == "__main__":
    key = jax.random.PRNGKey(0)
    kx, kp = jax.random.split(key)
    N, C, H, W = 2, 4, 16, 16
    x = jax.random.normal(kx, (N, C, H, W), jnp.float32)
    w1, b1, w2, b2 = init_params(kp, C, C)

    out = jax.block_until_ready(resblock_forward(x, w1, b1, w2, b2))
    assert out.shape == (N, C, H, W) and out.dtype == jnp.float32
    ref = _ref_resblock(x, w1, b1, w2, b2)
    err = float(jnp.max(jnp.abs(out - ref)))
    assert err < 1e-3, f"single ResBlock mismatch vs pure-JAX reference: {err}"

    # Chain 3 ResBlocks in the internal layout (mirrors GridNet's 9-deep stack;
    # no wrapper transposes / relayouts between blocks).
    params = []
    pk = kp
    for _ in range(3):
        pk, sub = jax.random.split(pk)
        params.append(init_params(sub, C, C))
    out_s = jax.block_until_ready(resblock_stack_forward(x, tuple(params)))
    ref_s = x
    for p in params:
        ref_s = _ref_resblock(ref_s, *p)
    err_s = float(jnp.max(jnp.abs(out_s - ref_s)))
    assert err_s < 1e-3, f"stacked ResBlock mismatch vs reference: {err_s}"

    print("KERNEL_OK")
</pallas_src>

<mosaic_0001>
module attributes {stable_mosaic.version = 11 : i64} {
  func.func @_fused_resblock_kernel(%arg0: i32, %arg1: memref<1x4x256xf32, #tpu.memory_space<vmem>>, %arg2: memref<9x4x4xf32, #tpu.memory_space<vmem>>, %arg3: memref<4x1xf32, #tpu.memory_space<vmem>>, %arg4: memref<9x4x4xf32, #tpu.memory_space<vmem>>, %arg5: memref<4x1xf32, #tpu.memory_space<vmem>>, %arg6: memref<1x4x256xf32, #tpu.memory_space<vmem>>) attributes {dimension_semantics = [#tpu.dimension_semantics<parallel>], iteration_bounds = array<i64: 2>, scalar_prefetch = 0 : i64, scratch_operands = 0 : i64, tpu.core_type = #tpu.core_type<tc>, window_params = [{transform_indices = @transform_0, window_bounds = array<i64: 1, 4, 256>}, {pipeline_mode = #tpu.pipeline_mode<synchronous>, transform_indices = @transform_1, window_bounds = array<i64: 9, 4, 4>}, {pipeline_mode = #tpu.pipeline_mode<synchronous>, transform_indices = @transform_2, window_bounds = array<i64: 4, 1>}, {pipeline_mode = #tpu.pipeline_mode<synchronous>, transform_indices = @transform_3, window_bounds = array<i64: 9, 4, 4>}, {pipeline_mode = #tpu.pipeline_mode<synchronous>, transform_indices = @transform_4, window_bounds = array<i64: 4, 1>}, {transform_indices = @transform_5, window_bounds = array<i64: 1, 4, 256>}]} {
    %c0 = arith.constant 0 : index
    %c0_0 = arith.constant 0 : index
    %c0_1 = arith.constant 0 : index
    %0 = vector.load %arg1[%c0, %c0_0, %c0_1] : memref<1x4x256xf32, #tpu.memory_space<vmem>>, vector<1x4x256xf32>
    %1 = vector.shape_cast %0 : vector<1x4x256xf32> to vector<4x256xf32>
    %2 = tpu.iota {dimensions = array<i32: 1>} : vector<4x256xi32>
    %c15_i32 = arith.constant 15 : i32
    %3 = vector.broadcast %c15_i32 : i32 to vector<4x256xi32>
    %4 = arith.andi %2, %3 : vector<4x256xi32>
    %c0_i32 = arith.constant 0 : i32
    %5 = vector.broadcast %c0_i32 : i32 to vector<4x256xi32>
    %6 = arith.cmpi eq, %4, %5 : vector<4x256xi32>
    %c15_i32_2 = arith.constant 15 : i32
    %7 = vector.broadcast %c15_i32_2 : i32 to vector<4x256xi32>
    %8 = arith.cmpi eq, %4, %7 : vector<4x256xi32>
    %c16_i32 = arith.constant 16 : i32
    %9 = vector.broadcast %c16_i32 : i32 to vector<4x256xi32>
    %10 = arith.cmpi slt, %2, %9 : vector<4x256xi32>
    %c240_i32 = arith.constant 240 : i32
    %11 = vector.broadcast %c240_i32 : i32 to vector<4x256xi32>
    %12 = arith.cmpi sge, %2, %11 : vector<4x256xi32>
    %c1_i32 = arith.constant 1 : i32
    %13 = tpu.dynamic_rotate %1 by %c1_i32 dim 1 : vector<4x256xf32>, i32 -> vector<4x256xf32>
    %c255_i32 = arith.constant 255 : i32
    %14 = tpu.dynamic_rotate %1 by %c255_i32 dim 1 : vector<4x256xf32>, i32 -> vector<4x256xf32>
    %15 = arith.select %6, %14, %13 : vector<4x256xi1>, vector<4x256xf32>
    %16 = arith.select %8, %13, %14 : vector<4x256xi1>, vector<4x256xf32>
    %cst = arith.constant 0.000000e+00 : f32
    %17 = vector.broadcast %cst : f32 to vector<4x256xf32>
    %c16_i32_3 = arith.constant 16 : i32
    %18 = tpu.dynamic_rotate %15 by %c16_i32_3 dim 1 : vector<4x256xf32>, i32 -> vector<4x256xf32>
    %c240_i32_4 = arith.constant 240 : i32
    %19 = tpu.dynamic_rotate %15 by %c240_i32_4 dim 1 : vector<4x256xf32>, i32 -> vector<4x256xf32>
    %20 = arith.select %10, %19, %18 : vector<4x256xi1>, vector<4x256xf32>
    %21 = arith.select %12, %18, %19 : vector<4x256xi1>, vector<4x256xf32>
    %c0_5 = arith.constant 0 : index
    %c0_6 = arith.constant 0 : index
    %c0_7 = arith.constant 0 : index
    %22 = vector.load %arg2[%c0_5, %c0_6, %c0_7] : memref<9x4x4xf32, #tpu.memory_space<vmem>>, vector<1x4x4xf32>
    %23 = vector.shape_cast %22 : vector<1x4x4xf32> to vector<4x4xf32>
    %cst_8 = arith.constant dense<0.000000e+00> : vector<4x256xf32>
    %24 = tpu.matmul %23, %20, %cst_8 {dimension_numbers = #tpu.dot_dimension_numbers<[1], [0], [0], [1], [0, 0, 1, 1], [], []>} : vector<4x4xf32>, vector<4x256xf32>, vector<4x256xf32> -> vector<4x256xf32>
    %25 = arith.addf %17, %24 : vector<4x256xf32>
    %c3 = arith.constant 3 : index
    %c0_9 = arith.constant 0 : index
    %c0_10 = arith.constant 0 : index
    %26 = vector.load %arg2[%c3, %c0_9, %c0_10] : memref<9x4x4xf32, #tpu.memory_space<vmem>>, vector<1x4x4xf32>
    %27 = vector.shape_cast %26 : vector<1x4x4xf32> to vector<4x4xf32>
    %cst_11 = arith.constant dense<0.000000e+00> : vector<4x256xf32>
    %28 = tpu.matmul %27, %15, %cst_11 {dimension_numbers = #tpu.dot_dimension_numbers<[1], [0], [0], [1], [0, 0, 1, 1], [], []>} : vector<4x4xf32>, vector<4x256xf32>, vector<4x256xf32> -> vector<4x256xf32>
    %29 = arith.addf %25, %28 : vector<4x256xf32>
    %c6 = arith.constant 6 : index
    %c0_12 = arith.constant 0 : index
    %c0_13 = arith.constant 0 : index
    %30 = vector.load %arg2[%c6, %c0_12, %c0_13] : memref<9x4x4xf32, #tpu.memory_space<vmem>>, vector<1x4x4xf32>
    %31 = vector.shape_cast %30 : vector<1x4x4xf32> to vector<4x4xf32>
    %cst_14 = arith.constant dense<0.000000e+00> : vector<4x256xf32>
    %32 = tpu.matmul %31, %21, %cst_14 {dimension_numbers = #tpu.dot_dimension_numbers<[1], [0], [0], [1], [0, 0, 1, 1], [], []>} : vector<4x4xf32>, vector<4x256xf32>, vector<4x256xf32> -> vector<4x256xf32>
    %33 = arith.addf %29, %32 : vector<4x256xf32>
    %c16_i32_15 = arith.constant 16 : i32
    %34 = tpu.dynamic_rotate %1 by %c16_i32_15 dim 1 : vector<4x256xf32>, i32 -> vector<4x256xf32>
    %c240_i32_16 = arith.constant 240 : i32
    %35 = tpu.dynamic_rotate %1 by %c240_i32_16 dim 1 : vector<4x256xf32>, i32 -> vector<4x256xf32>
    %36 = arith.select %10, %35, %34 : vector<4x256xi1>, vector<4x256xf32>
    %37 = arith.select %12, %34, %35 : vector<4x256xi1>, vector<4x256xf32>
    %c1 = arith.constant 1 : index
    %c0_17 = arith.constant 0 : index
    %c0_18 = arith.constant 0 : index
    %38 = vector.load %arg2[%c1, %c0_17, %c0_18] : memref<9x4x4xf32, #tpu.memory_space<vmem>>, vector<1x4x4xf32>
    %39 = vector.shape_cast %38 : vector<1x4x4xf32> to vector<4x4xf32>
    %cst_19 = arith.constant dense<0.000000e+00> : vector<4x256xf32>
    %40 = tpu.matmul %39, %36, %cst_19 {dimension_numbers = #tpu.dot_dimension_numbers<[1], [0], [0], [1], [0, 0, 1, 1], [], []>} : vector<4x4xf32>, vector<4x256xf32>, vector<4x256xf32> -> vector<4x256xf32>
    %41 = arith.addf %33, %40 : vector<4x256xf32>
    %c4 = arith.constant 4 : index
    %c0_20 = arith.constant 0 : index
    %c0_21 = arith.constant 0 : index
    %42 = vector.load %arg2[%c4, %c0_20, %c0_21] : memref<9x4x4xf32, #tpu.memory_space<vmem>>, vector<1x4x4xf32>
    %43 = vector.shape_cast %42 : vector<1x4x4xf32> to vector<4x4xf32>
    %cst_22 = arith.constant dense<0.000000e+00> : vector<4x256xf32>
    %44 = tpu.matmul %43, %1, %cst_22 {dimension_numbers = #tpu.dot_dimension_numbers<[1], [0], [0], [1], [0, 0, 1, 1], [], []>} : vector<4x4xf32>, vector<4x256xf32>, vector<4x256xf32> -> vector<4x256xf32>
    %45 = arith.addf %41, %44 : vector<4x256xf32>
    %c7 = arith.constant 7 : index
    %c0_23 = arith.constant 0 : index
    %c0_24 = arith.constant 0 : index
    %46 = vector.load %arg2[%c7, %c0_23, %c0_24] : memref<9x4x4xf32, #tpu.memory_space<vmem>>, vector<1x4x4xf32>
    %47 = vector.shape_cast %46 : vector<1x4x4xf32> to vector<4x4xf32>
    %cst_25 = arith.constant dense<0.000000e+00> : vector<4x256xf32>
    %48 = tpu.matmul %47, %37, %cst_25 {dimension_numbers = #tpu.dot_dimension_numbers<[1], [0], [0], [1], [0, 0, 1, 1], [], []>} : vector<4x4xf32>, vector<4x256xf32>, vector<4x256xf32> -> vector<4x256xf32>
    %49 = arith.addf %45, %48 : vector<4x256xf32>
    %c16_i32_26 = arith.constant 16 : i32
    %50 = tpu.dynamic_rotate %16 by %c16_i32_26 dim 1 : vector<4x256xf32>, i32 -> vector<4x256xf32>
    %c240_i32_27 = arith.constant 240 : i32
    %51 = tpu.dynamic_rotate %16 by %c240_i32_27 dim 1 : vector<4x256xf32>, i32 -> vector<4x256xf32>
    %52 = arith.select %10, %51, %50 : vector<4x256xi1>, vector<4x256xf32>
    %53 = arith.select %12, %50, %51 : vector<4x256xi1>, vector<4x256xf32>
    %c2 = arith.constant 2 : index
    %c0_28 = arith.constant 0 : index
    %c0_29 = arith.constant 0 : index
    %54 = vector.load %arg2[%c2, %c0_28, %c0_29] : memref<9x4x4xf32, #tpu.memory_space<vmem>>, vector<1x4x4xf32>
    %55 = vector.shape_cast %54 : vector<1x4x4xf32> to vector<4x4xf32>
    %cst_30 = arith.constant dense<0.000000e+00> : vector<4x256xf32>
    %56 = tpu.matmul %55, %52, %cst_30 {dimension_numbers = #tpu.dot_dimension_numbers<[1], [0], [0], [1], [0, 0, 1, 1], [], []>} : vector<4x4xf32>, vector<4x256xf32>, vector<4x256xf32> -> vector<4x256xf32>
    %57 = arith.addf %49, %56 : vector<4x256xf32>
    %c5 = arith.constant 5 : index
    %c0_31 = arith.constant 0 : index
    %c0_32 = arith.constant 0 : index
    %58 = vector.load %arg2[%c5, %c0_31, %c0_32] : memref<9x4x4xf32, #tpu.memory_space<vmem>>, vector<1x4x4xf32>
    %59 = vector.shape_cast %58 : vector<1x4x4xf32> to vector<4x4xf32>
    %cst_33 = arith.constant dense<0.000000e+00> : vector<4x256xf32>
    %60 = tpu.matmul %59, %16, %cst_33 {dimension_numbers = #tpu.dot_dimension_numbers<[1], [0], [0], [1], [0, 0, 1, 1], [], []>} : vector<4x4xf32>, vector<4x256xf32>, vector<4x256xf32> -> vector<4x256xf32>
    %61 = arith.addf %57, %60 : vector<4x256xf32>
    %c8 = arith.constant 8 : index
    %c0_34 = arith.constant 0 : index
    %c0_35 = arith.constant 0 : index
    %62 = vector.load %arg2[%c8, %c0_34, %c0_35] : memref<9x4x4xf32, #tpu.memory_space<vmem>>, vector<1x4x4xf32>
    %63 = vector.shape_cast %62 : vector<1x4x4xf32> to vector<4x4xf32>
    %cst_36 = arith.constant dense<0.000000e+00> : vector<4x256xf32>
    %64 = tpu.matmul %63, %53, %cst_36 {dimension_numbers = #tpu.dot_dimension_numbers<[1], [0], [0], [1], [0, 0, 1, 1], [], []>} : vector<4x4xf32>, vector<4x256xf32>, vector<4x256xf32> -> vector<4x256xf32>
    %65 = arith.addf %61, %64 : vector<4x256xf32>
    %c0_37 = arith.constant 0 : index
    %c0_38 = arith.constant 0 : index
    %66 = vector.load %arg3[%c0_37, %c0_38] : memref<4x1xf32, #tpu.memory_space<vmem>>, vector<4x1xf32>
    %67 = vector.broadcast %66 : vector<4x1xf32> to vector<4x256xf32>
    %68 = arith.addf %65, %67 : vector<4x256xf32>
    %cst_39 = arith.constant dense<0.000000e+00> : vector<4xf32>
    %69 = vector.multi_reduction <add>, %68, %cst_39 [1] : vector<4x256xf32> to vector<4xf32>
    %70 = vector.shape_cast %69 : vector<4xf32> to vector<4x1xf32>
    %cst_40 = arith.constant 3.906250e-03 : f32
    %71 = vector.broadcast %cst_40 : f32 to vector<4x1xf32>
    %72 = arith.mulf %70, %71 : vector<4x1xf32>
    %73 = arith.mulf %68, %68 : vector<4x256xf32>
    %cst_41 = arith.constant dense<0.000000e+00> : vector<4xf32>
    %74 = vector.multi_reduction <add>, %73, %cst_41 [1] : vector<4x256xf32> to vector<4xf32>
    %75 = vector.shape_cast %74 : vector<4xf32> to vector<4x1xf32>
    %cst_42 = arith.constant 3.906250e-03 : f32
    %76 = vector.broadcast %cst_42 : f32 to vector<4x1xf32>
    %77 = arith.mulf %75, %76 : vector<4x1xf32>
    %78 = arith.mulf %72, %72 : vector<4x1xf32>
    %79 = arith.subf %77, %78 : vector<4x1xf32>
    %80 = vector.broadcast %72 : vector<4x1xf32> to vector<4x256xf32>
    %81 = arith.subf %68, %80 : vector<4x256xf32>
    %cst_43 = arith.constant 9.99999974E-6 : f32
    %82 = vector.broadcast %cst_43 : f32 to vector<4x1xf32>
    %83 = arith.addf %79, %82 : vector<4x1xf32>
    %84 = math.rsqrt %83 : vector<4x1xf32>
    %85 = vector.broadcast %84 : vector<4x1xf32> to vector<4x256xf32>
    %86 = arith.mulf %81, %85 : vector<4x256xf32>
    %cst_44 = arith.constant 0.000000e+00 : f32
    %87 = vector.broadcast %cst_44 : f32 to vector<4x256xf32>
    %88 = arith.maximumf %86, %87 : vector<4x256xf32>
    %c1_i32_45 = arith.constant 1 : i32
    %89 = tpu.dynamic_rotate %88 by %c1_i32_45 dim 1 : vector<4x256xf32>, i32 -> vector<4x256xf32>
    %c255_i32_46 = arith.constant 255 : i32
    %90 = tpu.dynamic_rotate %88 by %c255_i32_46 dim 1 : vector<4x256xf32>, i32 -> vector<4x256xf32>
    %91 = arith.select %6, %90, %89 : vector<4x256xi1>, vector<4x256xf32>
    %92 = arith.select %8, %89, %90 : vector<4x256xi1>, vector<4x256xf32>
    %cst_47 = arith.constant 0.000000e+00 : f32
    %93 = vector.broadcast %cst_47 : f32 to vector<4x256xf32>
    %c16_i32_48 = arith.constant 16 : i32
    %94 = tpu.dynamic_rotate %91 by %c16_i32_48 dim 1 : vector<4x256xf32>, i32 -> vector<4x256xf32>
    %c240_i32_49 = arith.constant 240 : i32
    %95 = tpu.dynamic_rotate %91 by %c240_i32_49 dim 1 : vector<4x256xf32>, i32 -> vector<4x256xf32>
    %96 = arith.select %10, %95, %94 : vector<4x256xi1>, vector<4x256xf32>
    %97 = arith.select %12, %94, %95 : vector<4x256xi1>, vector<4x256xf32>
    %c0_50 = arith.constant 0 : index
    %c0_51 = arith.constant 0 : index
    %c0_52 = arith.constant 0 : index
    %98 = vector.load %arg4[%c0_50, %c0_51, %c0_52] : memref<9x4x4xf32, #tpu.memory_space<vmem>>, vector<1x4x4xf32>
    %99 = vector.shape_cast %98 : vector<1x4x4xf32> to vector<4x4xf32>
    %cst_53 = arith.constant dense<0.000000e+00> : vector<4x256xf32>
    %100 = tpu.matmul %99, %96, %cst_53 {dimension_numbers = #tpu.dot_dimension_numbers<[1], [0], [0], [1], [0, 0, 1, 1], [], []>} : vector<4x4xf32>, vector<4x256xf32>, vector<4x256xf32> -> vector<4x256xf32>
    %101 = arith.addf %93, %100 : vector<4x256xf32>
    %c3_54 = arith.constant 3 : index
    %c0_55 = arith.constant 0 : index
    %c0_56 = arith.constant 0 : index
    %102 = vector.load %arg4[%c3_54, %c0_55, %c0_56] : memref<9x4x4xf32, #tpu.memory_space<vmem>>, vector<1x4x4xf32>
    %103 = vector.shape_cast %102 : vector<1x4x4xf32> to vector<4x4xf32>
    %cst_57 = arith.constant dense<0.000000e+00> : vector<4x256xf32>
    %104 = tpu.matmul %103, %91, %cst_57 {dimension_numbers = #tpu.dot_dimension_numbers<[1], [0], [0], [1], [0, 0, 1, 1], [], []>} : vector<4x4xf32>, vector<4x256xf32>, vector<4x256xf32> -> vector<4x256xf32>
    %105 = arith.addf %101, %104 : vector<4x256xf32>
    %c6_58 = arith.constant 6 : index
    %c0_59 = arith.constant 0 : index
    %c0_60 = arith.constant 0 : index
    %106 = vector.load %arg4[%c6_58, %c0_59, %c0_60] : memref<9x4x4xf32, #tpu.memory_space<vmem>>, vector<1x4x4xf32>
    %107 = vector.shape_cast %106 : vector<1x4x4xf32> to vector<4x4xf32>
    %cst_61 = arith.constant dense<0.000000e+00> : vector<4x256xf32>
    %108 = tpu.matmul %107, %97, %cst_61 {dimension_numbers = #tpu.dot_dimension_numbers<[1], [0], [0], [1], [0, 0, 1, 1], [], []>} : vector<4x4xf32>, vector<4x256xf32>, vector<4x256xf32> -> vector<4x256xf32>
    %109 = arith.addf %105, %108 : vector<4x256xf32>
    %c16_i32_62 = arith.constant 16 : i32
    %110 = tpu.dynamic_rotate %88 by %c16_i32_62 dim 1 : vector<4x256xf32>, i32 -> vector<4x256xf32>
    %c240_i32_63 = arith.constant 240 : i32
    %111 = tpu.dynamic_rotate %88 by %c240_i32_63 dim 1 : vector<4x256xf32>, i32 -> vector<4x256xf32>
    %112 = arith.select %10, %111, %110 : vector<4x256xi1>, vector<4x256xf32>
    %113 = arith.select %12, %110, %111 : vector<4x256xi1>, vector<4x256xf32>
    %c1_64 = arith.constant 1 : index
    %c0_65 = arith.constant 0 : index
    %c0_66 = arith.constant 0 : index
    %114 = vector.load %arg4[%c1_64, %c0_65, %c0_66] : memref<9x4x4xf32, #tpu.memory_space<vmem>>, vector<1x4x4xf32>
    %115 = vector.shape_cast %114 : vector<1x4x4xf32> to vector<4x4xf32>
    %cst_67 = arith.constant dense<0.000000e+00> : vector<4x256xf32>
    %116 = tpu.matmul %115, %112, %cst_67 {dimension_numbers = #tpu.dot_dimension_numbers<[1], [0], [0], [1], [0, 0, 1, 1], [], []>} : vector<4x4xf32>, vector<4x256xf32>, vector<4x256xf32> -> vector<4x256xf32>
    %117 = arith.addf %109, %116 : vector<4x256xf32>
    %c4_68 = arith.constant 4 : index
    %c0_69 = arith.constant 0 : index
    %c0_70 = arith.constant 0 : index
    %118 = vector.load %arg4[%c4_68, %c0_69, %c0_70] : memref<9x4x4xf32, #tpu.memory_space<vmem>>, vector<1x4x4xf32>
    %119 = vector.shape_cast %118 : vector<1x4x4xf32> to vector<4x4xf32>
    %cst_71 = arith.constant dense<0.000000e+00> : vector<4x256xf32>
    %120 = tpu.matmul %119, %88, %cst_71 {dimension_numbers = #tpu.dot_dimension_numbers<[1], [0], [0], [1], [0, 0, 1, 1], [], []>} : vector<4x4xf32>, vector<4x256xf32>, vector<4x256xf32> -> vector<4x256xf32>
    %121 = arith.addf %117, %120 : vector<4x256xf32>
    %c7_72 = arith.constant 7 : index
    %c0_73 = arith.constant 0 : index
    %c0_74 = arith.constant 0 : index
    %122 = vector.load %arg4[%c7_72, %c0_73, %c0_74] : memref<9x4x4xf32, #tpu.memory_space<vmem>>, vector<1x4x4xf32>
    %123 = vector.shape_cast %122 : vector<1x4x4xf32> to vector<4x4xf32>
    %cst_75 = arith.constant dense<0.000000e+00> : vector<4x256xf32>
    %124 = tpu.matmul %123, %113, %cst_75 {dimension_numbers = #tpu.dot_dimension_numbers<[1], [0], [0], [1], [0, 0, 1, 1], [], []>} : vector<4x4xf32>, vector<4x256xf32>, vector<4x256xf32> -> vector<4x256xf32>
    %125 = arith.addf %121, %124 : vector<4x256xf32>
    %c16_i32_76 = arith.constant 16 : i32
    %126 = tpu.dynamic_rotate %92 by %c16_i32_76 dim 1 : vector<4x256xf32>, i32 -> vector<4x256xf32>
    %c240_i32_77 = arith.constant 240 : i32
    %127 = tpu.dynamic_rotate %92 by %c240_i32_77 dim 1 : vector<4x256xf32>, i32 -> vector<4x256xf32>
    %128 = arith.select %10, %127, %126 : vector<4x256xi1>, vector<4x256xf32>
    %129 = arith.select %12, %126, %127 : vector<4x256xi1>, vector<4x256xf32>
    %c2_78 = arith.constant 2 : index
    %c0_79 = arith.constant 0 : index
    %c0_80 = arith.constant 0 : index
    %130 = vector.load %arg4[%c2_78, %c0_79, %c0_80] : memref<9x4x4xf32, #tpu.memory_space<vmem>>, vector<1x4x4xf32>
    %131 = vector.shape_cast %130 : vector<1x4x4xf32> to vector<4x4xf32>
    %cst_81 = arith.constant dense<0.000000e+00> : vector<4x256xf32>
    %132 = tpu.matmul %131, %128, %cst_81 {dimension_numbers = #tpu.dot_dimension_numbers<[1], [0], [0], [1], [0, 0, 1, 1], [], []>} : vector<4x4xf32>, vector<4x256xf32>, vector<4x256xf32> -> vector<4x256xf32>
    %133 = arith.addf %125, %132 : vector<4x256xf32>
    %c5_82 = arith.constant 5 : index
    %c0_83 = arith.constant 0 : index
    %c0_84 = arith.constant 0 : index
    %134 = vector.load %arg4[%c5_82, %c0_83, %c0_84] : memref<9x4x4xf32, #tpu.memory_space<vmem>>, vector<1x4x4xf32>
    %135 = vector.shape_cast %134 : vector<1x4x4xf32> to vector<4x4xf32>
    %cst_85 = arith.constant dense<0.000000e+00> : vector<4x256xf32>
    %136 = tpu.matmul %135, %92, %cst_85 {dimension_numbers = #tpu.dot_dimension_numbers<[1], [0], [0], [1], [0, 0, 1, 1], [], []>} : vector<4x4xf32>, vector<4x256xf32>, vector<4x256xf32> -> vector<4x256xf32>
    %137 = arith.addf %133, %136 : vector<4x256xf32>
    %c8_86 = arith.constant 8 : index
    %c0_87 = arith.constant 0 : index
    %c0_88 = arith.constant 0 : index
    %138 = vector.load %arg4[%c8_86, %c0_87, %c0_88] : memref<9x4x4xf32, #tpu.memory_space<vmem>>, vector<1x4x4xf32>
    %139 = vector.shape_cast %138 : vector<1x4x4xf32> to vector<4x4xf32>
    %cst_89 = arith.constant dense<0.000000e+00> : vector<4x256xf32>
    %140 = tpu.matmul %139, %129, %cst_89 {dimension_numbers = #tpu.dot_dimension_numbers<[1], [0], [0], [1], [0, 0, 1, 1], [], []>} : vector<4x4xf32>, vector<4x256xf32>, vector<4x256xf32> -> vector<4x256xf32>
    %141 = arith.addf %137, %140 : vector<4x256xf32>
    %c0_90 = arith.constant 0 : index
    %c0_91 = arith.constant 0 : index
    %142 = vector.load %arg5[%c0_90, %c0_91] : memref<4x1xf32, #tpu.memory_space<vmem>>, vector<4x1xf32>
    %143 = vector.broadcast %142 : vector<4x1xf32> to vector<4x256xf32>
    %144 = arith.addf %141, %143 : vector<4x256xf32>
    %cst_92 = arith.constant dense<0.000000e+00> : vector<4xf32>
    %145 = vector.multi_reduction <add>, %144, %cst_92 [1] : vector<4x256xf32> to vector<4xf32>
    %146 = vector.shape_cast %145 : vector<4xf32> to vector<4x1xf32>
    %cst_93 = arith.constant 3.906250e-03 : f32
    %147 = vector.broadcast %cst_93 : f32 to vector<4x1xf32>
    %148 = arith.mulf %146, %147 : vector<4x1xf32>
    %149 = arith.mulf %144, %144 : vector<4x256xf32>
    %cst_94 = arith.constant dense<0.000000e+00> : vector<4xf32>
    %150 = vector.multi_reduction <add>, %149, %cst_94 [1] : vector<4x256xf32> to vector<4xf32>
    %151 = vector.shape_cast %150 : vector<4xf32> to vector<4x1xf32>
    %cst_95 = arith.constant 3.906250e-03 : f32
    %152 = vector.broadcast %cst_95 : f32 to vector<4x1xf32>
    %153 = arith.mulf %151, %152 : vector<4x1xf32>
    %154 = arith.mulf %148, %148 : vector<4x1xf32>
    %155 = arith.subf %153, %154 : vector<4x1xf32>
    %156 = vector.broadcast %148 : vector<4x1xf32> to vector<4x256xf32>
    %157 = arith.subf %144, %156 : vector<4x256xf32>
    %cst_96 = arith.constant 9.99999974E-6 : f32
    %158 = vector.broadcast %cst_96 : f32 to vector<4x1xf32>
    %159 = arith.addf %155, %158 : vector<4x1xf32>
    %160 = math.rsqrt %159 : vector<4x1xf32>
    %161 = vector.broadcast %160 : vector<4x1xf32> to vector<4x256xf32>
    %162 = arith.mulf %157, %161 : vector<4x256xf32>
    %163 = arith.addf %1, %162 : vector<4x256xf32>
    %c0_97 = arith.constant 0 : index
    %c0_98 = arith.constant 0 : index
    %c0_99 = arith.constant 0 : index
    %164 = vector.load %arg6[%c0_97, %c0_98, %c0_99] : memref<1x4x256xf32, #tpu.memory_space<vmem>>, vector<1x4x256xf32>
    %165 = vector.shape_cast %164 : vector<1x4x256xf32> to vector<4x256xf32>
    %166 = vector.shape_cast %163 : vector<4x256xf32> to vector<1x4x256xf32>
    tpu.vector_store %arg6[%c0_97, %c0_98, %c0_99], %166 {strides = array<i32>} : memref<1x4x256xf32, #tpu.memory_space<vmem>>, vector<1x4x256xf32>,
    return
  }
  func.func @transform_0(%arg0: i32) -> (i32, i32, i32) {
    %c0_i32 = arith.constant 0 : i32
    %c0_i32_0 = arith.constant 0 : i32
    %c0_i32_1 = arith.constant 0 : i32
    return %arg0, %c0_i32, %c0_i32_0 : i32, i32, i32
  }
  func.func @transform_1(%arg0: i32) -> (i32, i32, i32) {
    %c0_i32 = arith.constant 0 : i32
    %c0_i32_0 = arith.constant 0 : i32
    %c0_i32_1 = arith.constant 0 : i32
    %c0_i32_2 = arith.constant 0 : i32
    return %c0_i32, %c0_i32_0, %c0_i32_1 : i32, i32, i32
  }
  func.func @transform_2(%arg0: i32) -> (i32, i32) {
    %c0_i32 = arith.constant 0 : i32
    %c0_i32_0 = arith.constant 0 : i32
    %c0_i32_1 = arith.constant 0 : i32
    return %c0_i32, %c0_i32_0 : i32, i32
  }
  func.func @transform_3(%arg0: i32) -> (i32, i32, i32) {
    %c0_i32 = arith.constant 0 : i32
    %c0_i32_0 = arith.constant 0 : i32
    %c0_i32_1 = arith.constant 0 : i32
    %c0_i32_2 = arith.constant 0 : i32
    return %c0_i32, %c0_i32_0, %c0_i32_1 : i32, i32, i32
  }
  func.func @transform_4(%arg0: i32) -> (i32, i32) {
    %c0_i32 = arith.constant 0 : i32
    %c0_i32_0 = arith.constant 0 : i32
    %c0_i32_1 = arith.constant 0 : i32
    return %c0_i32, %c0_i32_0 : i32, i32
  }
  func.func @transform_5(%arg0: i32) -> (i32, i32, i32) {
    %c0_i32 = arith.constant 0 : i32
    %c0_i32_0 = arith.constant 0 : i32
    %c0_i32_1 = arith.constant 0 : i32
    return %arg0, %c0_i32, %c0_i32_0 : i32, i32, i32
  }
}

</mosaic_0001>

<bundles_post_ra>
// kernel: resblock_forward.1
= control target key start
LH: loop header
LB: loop body
LE: loop exit
PB: predicated region body
PF: predicated region fallthrough
CT: control target
= control target key end

     0   :  { %s1644_s18 = smov 0   ;;  %s1995_s0 = inlined_call_operand.vmem [shape: f32[2,4,256], index: 0, kind: input, shape index: {}]   ;;  %s1996_s1 = inlined_call_operand.vmem [shape: f32[9,4,4], index: 1, kind: input, shape index: {}]   ;;  %s1997_s2 = inlined_call_operand.vmem [shape: f32[4,1], index: 2, kind: input, shape index: {}]   ;;  %s1998_s3 = inlined_call_operand.vmem [shape: f32[9,4,4], index: 3, kind: input, shape index: {}]   ;;  %s1999_s4 = inlined_call_operand.vmem [shape: f32[4,1], index: 4, kind: input, shape index: {}]   ;;  %s2000_s5 = inlined_call_operand.vmem [shape: f32[2,4,256], index: 5, kind: output, shape index: {}]  }
   0x1 LB: > { %s1480_s19 = sadd.s32 4294967295, %s1607_s18   ;;  %p1484_p0 = scmp.ge.s32.totalorder %s1607_s18, 1  ;;  %s1607_s18 = sphi %s1644_s18, %s15_s18  }
   0x2   : > { %p187_p1 = scmp.lt.s32.totalorder %s1607_s18, 3 }
   0x4   : > { %p188_p2 = pnand %p1484_p0, %p187_p1 }
   0x5   : > { %p215_p3 = scmp.lt.s32.totalorder (!%p188_p2), %s1480_s19, 1  ;;  %s1609_s24 = smov (!%p188_p2), 1  }
   0x6   : > { %191 = sbr.rel (%p188_p2) target bundleno = 1169 (0x491), region = 40  ;;  %s1610_s25 = smov (!%p188_p2), 127  }
   0x7   : > { %s1611_s26 = smov (!%p188_p2), 16   ;;  %s1612_s27 = smov (!%p188_p2), 112  }
   0xb   : > { %s2010_s19 = smov (!%p215_p3, %s1480_s19), 1  ;;  %v226_v7 = vlaneseq  ;;  %vm292_vm4 = vcmask 1043456   ;;  %v1489_v30 = vld [vmem:[%s1996_s1 + $0xc] sm:$0xf]  ;;  %vm288_vm7 = vcmask 31744   ;;  %v1613_v47 = vmov 0  }
   0xc   : > { %s1579_s20 = sshll.u32 %s2010_s19, 3  ;;  %v285_v34 = vld [vmem:[%s1996_s1] sm:$0xf]  ;;  %v1498_v41 = vld [vmem:[%s1996_s1 + $0x18] sm:$0xf]  ;;  %1594 = vset.pattern.permute.xlu1 %v1613_v47  ;;  %1595 = vset.pattern.permute.xlu2 %v1613_v47 }
   0xd   : > { %s219_s23 = scalar_lea.vmem %s1995_s0, %s1579_s20  ;;  %v1671_v11 = vand.u32 127, %v226_v7  ;;  %v802_v46 = vld [vmem:[%s1997_s2] sm:$0xf]  ;;  %v1503_v53 = vld [vmem:[%s1996_s1 + $0x4] sm:$0xf]  ;;  %1596 = vset.pattern.permute.xlu0 %v1613_v47 }
   0xe   : > { %v1660_v0 = vld [vmem:[%s219_s23] sm:$0xff]  ;;  %v1508_v58 = vld [vmem:[%s1996_s1 + $0x10] sm:$0xf]  ;;  %v1513_v61 = vld [vmem:[%s1996_s1 + $0x1c] sm:$0xf] }
   0xf   : > { %240 = vst [vmem:[#allocation1] ss:$2 sm:$0xff] %v1660_v0  ;;  %v1675_v12 = vadd.s32 128, %v1671_v11  ;;  %v229_v15 = vand.u32 15, %v1671_v11  ;;  %vm249_vm0 = vcmp.lt.s32.totalorder %v1671_v11, 1  ;;  %vm261_vm1 = vcmp.lt.s32.totalorder %v1671_v11, 127 }
  0x10   : > { %vm235_vm8 = vcmp.lt.s32.totalorder %v1671_v11, 16  ;;  %vm278_vm9 = vcmp.lt.s32.totalorder %v1671_v11, 112  ;;  %v1518_v63 = vld [vmem:[%s1996_s1 + $0x8] sm:$0xf]  ;;  %v1572_v11 = vld [vmem:[%s1998_s3 + $0x20] sm:$0xf] }
  0x11   : > { %v230_v14 = vand.u32 15, %v1675_v12  ;;  %vm1685_vm3 = vcmp.eq.s32.totalorder %v229_v15, 0  ;;  %vm1713_vm6 = vcmp.eq.s32.totalorder %v229_v15, 15  ;;  %vm238_vm10 = vcmp.ge.s32.totalorder %v1675_v12, 240 }
  0x13   : > { %vm1681_vm2 = vcmp.eq.s32.totalorder %v230_v14, 0  ;;  %vm1709_vm5 = vcmp.eq.s32.totalorder %v230_v14, 15 }
  0x16   : > { %v241_v1 = vld.sshfl [vmem:[#allocation1] sm:$0xff pattern:$0x75316420]  ;;  %v242_v2 = vld.sshfl [vmem:[#allocation1 + $0x8] sm:$0xff pattern:$0x75316420] }
  0x17   : > { %245 = vrot.lane.b32.xlu0 %v241_v1, %s1609_s24  ;;  %252 = vst [vmem:[#allocation1] ss:$2 sm:$0xff] %v1660_v0 }
  0x1e   : > { %v253_v3 = vld.sshfl [vmem:[#allocation1] sm:$0xff pattern:$0x75316420]  ;;  %v254_v4 = vld.sshfl [vmem:[#allocation1 + $0x8] sm:$0xff pattern:$0x75316420] }
  0x1f   : > { %247 = vrot.lane.b32.xlu0 %v242_v2, %s1609_s24  ;;  %257 = vrot.lane.b32.xlu1 %v253_v3, %s1610_s25  ;;  %441 = vst [vmem:[#allocation1] ss:$2 sm:$0xff] %v1660_v0  ;;  %v1523_v3 = vld [vmem:[%s1996_s1 + $0x14] sm:$0xf] }
  0x26   : > { %v442_v5 = vld.sshfl [vmem:[#allocation1] sm:$0xff pattern:$0x75316420]  ;;  %v443_v6 = vld.sshfl [vmem:[#allocation1 + $0x8] sm:$0xff pattern:$0x75316420] }
  0x27   : > { %259 = vrot.lane.b32.xlu1 %v254_v4, %s1610_s25  ;;  %446 = vrot.lane.b32.xlu2 %v442_v5, %s1611_s26  ;;  %452 = vst [vmem:[#allocation1] ss:$2 sm:$0xff] %v1660_v0 }
  0x2e   : > { %v453_v9 = vld.sshfl [vmem:[#allocation1] sm:$0xff pattern:$0x75316420]  ;;  %v454_v10 = vld.sshfl [vmem:[#allocation1 + $0x8] sm:$0xff pattern:$0x75316420] }
  0x2f   : > { %522 = vst [vmem:[#allocation1] ss:$2 sm:$0xff] %v1660_v0 }
  0x36   : > { %v524_v44 = vld.sshfl [vmem:[#allocation1 + $0x8] sm:$0xff pattern:$0x75316420]  ;;  %v523_v45 = vld.sshfl [vmem:[#allocation1] sm:$0xff pattern:$0x75316420] }
  0x81   : > { %v447_v31 = vpop.permute.xlu2 %446 }
  0x89   : > { %v246_v8 = vpop.permute.xlu0 %245 }
  0x91   : > { %v258_v13 = vpop.permute.xlu1 %257  ;;  %v248_v16 = vpop.permute.xlu0 %247 }
  0x92   : > { %v250_v20 = vsel %vm249_vm0, %v246_v8, %v248_v16  ;;  %v251_v21 = vsel %vm249_vm0, %v248_v16, %v246_v8 }
  0x99   : > { %v260_v19 = vpop.permute.xlu1 %259 }
  0x9a   : > { %v262_v22 = vsel %vm261_vm1, %v258_v13, %v260_v19  ;;  %v263_v23 = vsel %vm261_vm1, %v260_v19, %v258_v13 }
  0x9b   : > { %v265_v24 = vsel %vm1681_vm2, %v263_v23, %v250_v20  ;;  %v264_v25 = vsel %vm1685_vm3, %v262_v22, %v251_v21  ;;  %v267_v28 = vsel %vm1709_vm5, %v250_v20, %v263_v23  ;;  %v266_v29 = vsel %vm1713_vm6, %v251_v21, %v262_v22 }
  0x9c   : > { %276 = vrot.lane.b32.xlu1 %v265_v24, %s1612_s27  ;;  %1492 = vmatpush.msk.msra.mxu1 %vm292_vm4, %v265_v24 }
  0x9d   : > { %274 = vrot.lane.b32.xlu0 %v264_v25, %s1612_s27  ;;  %1490 = vmatpush.msk.msra.mxu0 %vm292_vm4, %v264_v25 }
  0x9e   : > { %268 = vrot.lane.b32.xlu2 %v264_v25, %s1611_s26  ;;  %1493 = vmatmul.msk.f32.vlgmr.msra.gmra.mxu1 %vm288_vm7, %v1489_v30 }
  0x9f   : > { %1491 = vmatmul.msk.f32.vlgmr.msra.gmra.mxu0 %vm288_vm7, %v1489_v30 }
  0xa4   : > { %457 = vrot.lane.b32.xlu1 %v453_v9, %s1612_s27  ;;  %v1528_v9 = vld [vmem:[%s1996_s1 + $0x20] sm:$0xf] }
  0xa5   : > { %448 = vrot.lane.b32.xlu0 %v443_v6, %s1611_s26 }
  0xa6   : > { %270 = vrot.lane.b32.xlu2 %v265_v24, %s1611_s26 }
  0xac   : > { %629 = vrot.lane.b32.xlu1 %v267_v28, %s1611_s26 }
  0xad   : > { %627 = vrot.lane.b32.xlu0 %v266_v29, %s1611_s26 }
  0xae   : > { %459 = vrot.lane.b32.xlu2 %v454_v10, %s1612_s27 }
  0xb4   : > { %805 = vperm.xlu1 %1594, %v802_v46  }
  0xb5   : > { %635 = vrot.lane.b32.xlu0 %v267_v28, %s1612_s27 }
  0xb6   : > { %633 = vrot.lane.b32.xlu2 %v266_v29, %s1612_s27 }
  0xf8   : > { %v269_v32 = vpop.permute.xlu2 %268 }
 0x100   : > { %v271_v33 = vpop.permute.xlu2 %270 }
 0x101   : > { %v272_v35 = vsel %vm235_vm8, %v269_v32, %v271_v33  ;;  %v273_v38 = vsel %vm235_vm8, %v271_v33, %v269_v32 }
 0x102   : > { %1496 = vmatpush.msk.msra.mxu3 %vm292_vm4, %v272_v35 }
 0x103   : > { %1497 = vmatmul.msk.f32.vlgmr.msra.gmra.mxu3 %vm288_vm7, %v285_v34 }
 0x108   : > { %v460_v48 = vpop.permute.xlu2 %459 }
 0x10e   : > { %v277_v36 = vpop.permute.xlu1 %276 }
 0x10f   : > { %v275_v37 = vpop.permute.xlu0 %274 }
 0x110   : > { %v280_v39 = vsel %vm278_vm9, %v277_v36, %v275_v37  ;;  %v279_v40 = vsel %vm278_vm9, %v275_v37, %v277_v36  ;;  %v634_v1 = vpop.permute.xlu2 %633 }
 0x111   : > { %1499 = vmatpush.msk.msrb.mxu0 %vm292_vm4, %v279_v40  ;;  %v281_v42 = vsel %vm235_vm8, %v279_v40, %v273_v38  ;;  %v284_v43 = vsel %vm238_vm10, %v272_v35, %v280_v39 }
 0x112   : > { %1494 = vmatpush.msk.msra.mxu2 %vm292_vm4, %v281_v42  ;;  %1501 = vmatpush.msk.msrb.mxu1 %vm292_vm4, %v284_v43 }
 0x113   : > { %1495 = vmatmul.msk.f32.vlgmr.msra.gmra.mxu2 %vm288_vm7, %v285_v34  ;;  %1502 = vmatmul.msk.f32.vlgmr.msrb.gmra.mxu1 %vm288_vm7, %v1498_v41 }
 0x114   : > { %1500 = vmatmul.msk.f32.vlgmr.msrb.gmra.mxu0 %vm288_vm7, %v1498_v41  ;;  %1511 = vmatpush.msk.msra.mxu1 %vm292_vm4, %v524_v44 }
 0x115   : > { %1509 = vmatpush.msk.msra.mxu0 %vm292_vm4, %v523_v45 }
 0x116   : > { %v458_v49 = vpop.permute.xlu1 %457 }
 0x117   : > { %v449_v50 = vpop.permute.xlu0 %448  ;;  %v461_v51 = vsel %vm278_vm9, %v458_v49, %v460_v48  ;;  %v462_v52 = vsel %vm278_vm9, %v460_v48, %v458_v49 }
 0x118   : > { %v451_v54 = vsel %vm235_vm8, %v449_v50, %v447_v31  ;;  %v450_v55 = vsel %vm235_vm8, %v447_v31, %v449_v50 }
 0x119   : > { %v466_v56 = vsel %vm238_vm10, %v450_v55, %v462_v52  ;;  %1506 = vmatpush.msk.msrb.mxu3 %vm292_vm4, %v450_v55  ;;  %v463_v57 = vsel %vm235_vm8, %v461_v51, %v451_v54 }
 0x11a   : > { %1504 = vmatpush.msk.msrb.mxu2 %vm292_vm4, %v463_v57  ;;  %1507 = vmatmul.msk.f32.vlgmr.msrb.gmra.mxu3 %vm288_vm7, %v1503_v53 }
 0x11b   : > { %1516 = vmatpush.msk.msra.mxu3 %vm292_vm4, %v466_v56  ;;  %1505 = vmatmul.msk.f32.vlgmr.msrb.gmra.mxu2 %vm288_vm7, %v1503_v53  ;;  %v336_v10 = vpop.f32.mrf.mxu1 }
 0x11c   : > { %1514 = vmatpush.msk.msra.mxu2 %vm292_vm4, %v461_v51  ;;  %1512 = vmatmul.msk.f32.vlgmr.msra.gmra.mxu1 %vm288_vm7, %v1508_v58  ;;  %v316_v13 = vpop.f32.mrf.mxu0 }
 0x11d   : > { %1526 = vmatpush.msk.msrb.mxu3 %vm292_vm4, %v267_v28  ;;  %1510 = vmatmul.msk.f32.vlgmr.msra.gmra.mxu0 %vm288_vm7, %v1508_v58 }
 0x11e   : > { %1524 = vmatpush.msk.msrb.mxu2 %vm292_vm4, %v266_v29  ;;  %v630_v59 = vpop.permute.xlu1 %629 }
 0x11f   : > { %v628_v60 = vpop.permute.xlu0 %627 }
 0x120   : > { %v631_v62 = vsel %vm235_vm8, %v628_v60, %v630_v59  ;;  %v632_v4 = vsel %vm235_vm8, %v630_v59, %v628_v60 }
 0x121   : > { %1521 = vmatpush.msk.msrb.mxu1 %vm292_vm4, %v631_v62 }
 0x122   : > { %1517 = vmatmul.msk.f32.vlgmr.msra.gmra.mxu3 %vm288_vm7, %v1513_v61 }
 0x123   : > { %1515 = vmatmul.msk.f32.vlgmr.msra.gmra.mxu2 %vm288_vm7, %v1513_v61 }
 0x124   : > { %1522 = vmatmul.msk.f32.vlgmr.msrb.gmra.mxu1 %vm288_vm7, %v1518_v63 }
 0x126   : > { %v806_v46 = vpop.permute.xlu1 %805 }
 0x127   : > { %v636_v2 = vpop.permute.xlu0 %635 }
 0x128   : > { %v637_v5 = vsel %vm278_vm9, %v634_v1, %v636_v2  ;;  %v638_v6 = vsel %vm278_vm9, %v636_v2, %v634_v1 }
 0x129   : > { %v639_v7 = vsel %vm235_vm8, %v637_v5, %v632_v4  ;;  %v642_v8 = vsel %vm238_vm10, %v631_v62, %v638_v6 }
 0x12a   : > { %1519 = vmatpush.msk.msrb.mxu0 %vm292_vm4, %v639_v7  ;;  %1527 = vmatmul.msk.f32.vlgmr.msrb.gmra.mxu3 %vm288_vm7, %v1523_v3 }
 0x12b   : > { %1531 = vmatpush.msk.msra.mxu1 %vm292_vm4, %v642_v8  ;;  %1520 = vmatmul.msk.f32.vlgmr.msrb.gmra.mxu0 %vm288_vm7, %v1518_v63 }
 0x12c   : > { %1525 = vmatmul.msk.f32.vlgmr.msrb.gmra.mxu2 %vm288_vm7, %v1523_v3  ;;  %1529 = vmatpush.msk.msra.mxu0 %vm292_vm4, %v637_v5 }
 0x12d   : > { %1532 = vmatmul.msk.f32.vlgmr.msra.gmra.mxu1 %vm288_vm7, %v1528_v9 }
 0x133   : > { %1530 = vmatmul.msk.f32.vlgmr.msra.gmra.mxu0 %vm288_vm7, %v1528_v9 }
 0x186   : > { %v385_v16 = vpop.f32.mrf.mxu3 }
 0x187   : > { %v386_v21 = vadd.f32 %v385_v16, %v336_v10 }
 0x190   : > { %v436_v14 = vpop.f32.mrf.mxu1 }
 0x191   : > { %v416_v15 = vpop.f32.mrf.mxu0  ;;  %v440_v28 = vadd.f32 %v436_v14, %v386_v21 }
 0x196   : > { %v365_v19 = vpop.f32.mrf.mxu2 }
 0x197   : > { %v366_v23 = vadd.f32 %v365_v19, %v316_v13 }
 0x199   : > { %v569_v20 = vpop.f32.mrf.mxu1  ;;  %v439_v29 = vadd.f32 %v416_v15, %v366_v23 }
 0x19a   : > { %v549_v25 = vpop.f32.mrf.mxu0 }
 0x19d   : > { %v515_v22 = vpop.f32.mrf.mxu3 }
 0x19e   : > { %v495_v24 = vpop.f32.mrf.mxu2  ;;  %v519_v30 = vadd.f32 %v515_v22, %v440_v28 }
 0x19f   : > { %v518_v32 = vadd.f32 %v495_v24, %v439_v29 }
 0x1a0   : > { %v573_v34 = vadd.f32 %v569_v20, %v519_v30 }
 0x1a1   : > { %v691_v31 = vpop.f32.mrf.mxu1  ;;  %v572_v36 = vadd.f32 %v549_v25, %v518_v32 }
 0x1a5   : > { %v622_v33 = vpop.f32.mrf.mxu3 }
 0x1a6   : > { %v602_v35 = vpop.f32.mrf.mxu2  ;;  %v626_v37 = vadd.f32 %v622_v33, %v573_v34  ;;  %v1533_v34 = vld [vmem:[%s1998_s3 + $0xc] sm:$0xf] }
 0x1a7   : > { %v625_v39 = vadd.f32 %v602_v35, %v572_v36 }
 0x1a8   : > { %v671_v38 = vpop.f32.mrf.mxu0  ;;  %v695_v40 = vadd.f32 %v691_v31, %v626_v37 }
 0x1a9   : > { %v694_v43 = vadd.f32 %v671_v38, %v625_v39  ;;  %v875_v39 = vld [vmem:[%s1998_s3] sm:$0xf] }
 0x1aa   : > { %v797_v42 = vpop.f32.mrf.mxu1 }
 0x1ad   : > { %v744_v41 = vpop.f32.mrf.mxu3 }
 0x1ae   : > { %v748_v44 = vadd.f32 %v744_v41, %v695_v40  ;;  %v1379_v41 = vld [vmem:[%s1999_s4] sm:$0xf] }
 0x1af   : > { %v724_v45 = vpop.f32.mrf.mxu2 }
 0x1b0   : > { %v747_v47 = vadd.f32 %v724_v45, %v694_v43  ;;  %v801_v48 = vadd.f32 %v797_v42, %v748_v44  ;;  %v777_v49 = vpop.f32.mrf.mxu0 }
 0x1b2   : > { %v800_v50 = vadd.f32 %v777_v49, %v747_v47  ;;  %v809_v51 = vadd.f32 %v806_v46, %v801_v48  ;;  %v1542_v47 = vld [vmem:[%s1998_s3 + $0x18] sm:$0xf] }
 0x1b4   : > { %v808_v52 = vadd.f32 %v806_v46, %v800_v50  ;;  %v811_v53 = vsel %vm292_vm4, %v809_v51, 0.0  ;;  %v817_v54 = vmul.f32 %v809_v51, %v809_v51 }
 0x1b6   : > { %v810_v55 = vsel %vm292_vm4, %v808_v52, 0.0  ;;  %v816_v56 = vmul.f32 %v808_v52, %v808_v52  ;;  %v819_v57 = vsel %vm292_vm4, %v817_v54, 0.0 }
 0x1b7   : > { %v812_v58 = vadd.f32 %v811_v53, %v810_v55 }
 0x1b8   : > { %v818_v59 = vsel %vm292_vm4, %v816_v56, 0.0  ;;  %v1547_v56 = vld [vmem:[%s1998_s3 + $0x4] sm:$0xf] }
 0x1b9   : > { %813 = vadd.xlane.f32.xlu2 %v812_v58  ;;  %v820_v60 = vadd.f32 %v819_v57, %v818_v59  ;;  %v1552_v59 = vld [vmem:[%s1998_s3 + $0x10] sm:$0xf] }
 0x1bb   : > { %821 = vadd.xlane.f32.xlu0 %v820_v60 }
 0x22c   : > { %v814_v61 = vpop.xlane.xlu2 %813 }
 0x22d   : > { %v815_v62 = vmul.f32 0.00390625, %v814_v61  ;;  %v1557_v61 = vld [vmem:[%s1998_s3 + $0x1c] sm:$0xf] }
 0x22e   : > { %v822_v63 = vpop.xlane.xlu0 %821 }
 0x22f   : > { %v823_v1 = vmul.f32 0.00390625, %v822_v63  ;;  %v824_v2 = vmul.f32 %v815_v62, %v815_v62  ;;  %v826_v13 = vsub.f32 %v808_v52, %v815_v62  ;;  %v827_v19 = vsub.f32 %v809_v51, %v815_v62 }
 0x231   : > { %v825_v3 = vsub.f32 %v823_v1, %v824_v2 }
 0x233   : > { %v828_v4 = vadd.f32 1e-05, %v825_v3 }
 0x235   : > { %1597 = vrsqrt.f32 %v828_v4  ;;  %vm835_vm12 = vweird.f32 %v828_v4 }
 0x23b   : > { %v1598_v5 = vpop.eup %1597 }
 0x23c   : > { %v830_v6 = vmul.f32 %v1598_v5, %v828_v4  ;;  %vm836_vm11 = vweird.f32 %v1598_v5  ;;  %v1562_v4 = vld [vmem:[%s1998_s3 + $0x8] sm:$0xf] }
 0x23d   : > { %vm837_vm13 = vmor %vm835_vm12, %vm836_vm11 }
 0x23e   : > { %v831_v7 = vmul.f32 %v1598_v5, %v830_v6 }
 0x240   : > { %v832_v8 = vmul.f32 0.5, %v831_v7  ;;  %v1567_v7 = vld [vmem:[%s1998_s3 + $0x14] sm:$0xf] }
 0x242   : > { %v833_v9 = vsub.f32 1.5, %v832_v8 }
 0x244   : > { %v834_v10 = vmul.f32 %v1598_v5, %v833_v9 }
 0x246   : > { %v838_v14 = vsel %vm837_vm13, %v1598_v5, %v834_v10 }
 0x247   : > { %v839_v15 = vmul.f32 %v838_v14, %v826_v13  ;;  %v840_v20 = vmul.f32 %v838_v14, %v827_v19 }
 0x249   : > { %v1833_v16 = vmax.f32 %v839_v15, 0.0  ;;  %v1837_v21 = vmax.f32 %v840_v20, 0.0 }
 0x24b   : > { %843 = vrot.lane.b32.xlu1 %v1833_v16, %s1609_s24 }
 0x253   : > { %845 = vrot.lane.b32.xlu1 %v1837_v21, %s1609_s24  ;;  %s224_s24 = scalar_lea.vmem %s2000_s5, %s1579_s20 }
 0x25b   : > { %849 = vrot.lane.b32.xlu1 %v1833_v16, %s1610_s25 }
 0x263   : > { %851 = vrot.lane.b32.xlu1 %v1837_v21, %s1610_s25 }
 0x26b   : > { %1029 = vrot.lane.b32.xlu1 %v1833_v16, %s1611_s26 }
 0x273   : > { %1031 = vrot.lane.b32.xlu1 %v1837_v21, %s1611_s26 }
 0x2bd   : > { %v844_v22 = vpop.permute.xlu1 %843 }
 0x2c5   : > { %v846_v23 = vpop.permute.xlu1 %845 }
 0x2c6   : > { %v847_v28 = vsel %vm249_vm0, %v844_v22, %v846_v23  ;;  %v848_v29 = vsel %vm249_vm0, %v846_v23, %v844_v22 }
 0x2cd   : > { %v850_v24 = vpop.permute.xlu1 %849 }
 0x2d5   : > { %v852_v25 = vpop.permute.xlu1 %851 }
 0x2d6   : > { %v853_v30 = vsel %vm261_vm1, %v850_v24, %v852_v25  ;;  %v854_v31 = vsel %vm261_vm1, %v852_v25, %v850_v24 }
 0x2d7   : > { %v856_v32 = vsel %vm1681_vm2, %v854_v31, %v847_v28  ;;  %v855_v33 = vsel %vm1685_vm3, %v853_v30, %v848_v29  ;;  %v858_v17 = vsel %vm1709_vm5, %v847_v28, %v854_v31  ;;  %v857_v18 = vsel %vm1713_vm6, %v848_v29, %v853_v30 }
 0x2d8   : > { %867 = vrot.lane.b32.xlu0 %v856_v32, %s1612_s27  ;;  %861 = vrot.lane.b32.xlu2 %v856_v32, %s1611_s26 }
 0x2d9   : > { %1536 = vmatpush.msk.msra.mxu3 %vm292_vm4, %v856_v32  ;;  %859 = vrot.lane.b32.xlu1 %v855_v33, %s1611_s26 }
 0x2da   : > { %1534 = vmatpush.msk.msra.mxu2 %vm292_vm4, %v855_v33  ;;  %1537 = vmatmul.msk.f32.vlgmr.msra.gmra.mxu3 %vm288_vm7, %v1533_v34 }
 0x2db   : > { %1535 = vmatmul.msk.f32.vlgmr.msra.gmra.mxu2 %vm288_vm7, %v1533_v34 }
 0x2dd   : > { %v1030_v26 = vpop.permute.xlu1 %1029 }
 0x2e0   : > { %1037 = vrot.lane.b32.xlu0 %v1837_v21, %s1612_s27  ;;  %1035 = vrot.lane.b32.xlu2 %v1833_v16, %s1612_s27 }
 0x2e1   : > { %865 = vrot.lane.b32.xlu1 %v855_v33, %s1612_s27 }
 0x2e5   : > { %v1032_v35 = vpop.permute.xlu1 %1031 }
 0x2e6   : > { %v1033_v40 = vsel %vm235_vm8, %v1030_v26, %v1032_v35  ;;  %v1034_v52 = vsel %vm235_vm8, %v1032_v35, %v1030_v26 }
 0x2e8   : > { %1206 = vrot.lane.b32.xlu2 %v858_v17, %s1611_s26  ;;  %1210 = vrot.lane.b32.xlu0 %v857_v18, %s1612_s27 }
 0x2e9   : > { %1204 = vrot.lane.b32.xlu1 %v857_v18, %s1611_s26 }
 0x2f0   : > { %1382 = vperm.xlu2 %1595, %v1379_v41  }
 0x2f1   : > { %1212 = vrot.lane.b32.xlu1 %v858_v17, %s1612_s27 }
 0x332   : > { %v862_v27 = vpop.permute.xlu2 %861 }
 0x33a   : > { %v1036_v42 = vpop.permute.xlu2 %1035 }
 0x342   : > { %v1207_v57 = vpop.permute.xlu2 %1206 }
 0x34a   : > { %v868_v36 = vpop.permute.xlu0 %867 }
 0x34b   : > { %v860_v37 = vpop.permute.xlu1 %859 }
 0x34c   : > { %v863_v38 = vsel %vm235_vm8, %v860_v37, %v862_v27  ;;  %v864_v48 = vsel %vm235_vm8, %v862_v27, %v860_v37 }
 0x34d   : > { %1540 = vmatpush.msk.msrb.mxu1 %vm292_vm4, %v863_v38 }
 0x34e   : > { %1541 = vmatmul.msk.f32.vlgmr.msrb.gmra.mxu1 %vm288_vm7, %v875_v39 }
 0x34f   : > { %1550 = vmatpush.msk.msra.mxu1 %vm292_vm4, %v1033_v40 }
 0x352   : > { %v1038_v43 = vpop.permute.xlu0 %1037 }
 0x353   : > { %v1039_v44 = vsel %vm278_vm9, %v1036_v42, %v1038_v43  ;;  %v1040_v45 = vsel %vm278_vm9, %v1038_v43, %v1036_v42  ;;  %v866_v46 = vpop.permute.xlu1 %865 }
 0x354   : > { %v1044_v49 = vsel %vm238_vm10, %v1033_v40, %v1040_v45  ;;  %v869_v50 = vsel %vm278_vm9, %v866_v46, %v868_v36  ;;  %v870_v51 = vsel %vm278_vm9, %v868_v36, %v866_v46  ;;  %v1041_v55 = vsel %vm235_vm8, %v1039_v44, %v1034_v52  ;;  %v1383_v40 = vpop.permute.xlu2 %1382 }
 0x355   : > { %v871_v53 = vsel %vm235_vm8, %v869_v50, %v864_v48  ;;  %v874_v54 = vsel %vm238_vm10, %v863_v38, %v870_v51  ;;  %1543 = vmatpush.msk.msrb.mxu2 %vm292_vm4, %v869_v50  ;;  %1560 = vmatpush.msk.msrb.mxu1 %vm292_vm4, %v1044_v49 }
 0x356   : > { %1538 = vmatpush.msk.msrb.mxu0 %vm292_vm4, %v871_v53  ;;  %1544 = vmatmul.msk.f32.vlgmr.msrb.gmra.mxu2 %vm288_vm7, %v1542_v47 }
 0x357   : > { %1545 = vmatpush.msk.msrb.mxu3 %vm292_vm4, %v874_v54  ;;  %1553 = vmatpush.msk.msra.mxu2 %vm292_vm4, %v1833_v16 }
 0x358   : > { %1539 = vmatmul.msk.f32.vlgmr.msrb.gmra.mxu0 %vm288_vm7, %v875_v39  ;;  %1546 = vmatmul.msk.f32.vlgmr.msrb.gmra.mxu3 %vm288_vm7, %v1542_v47 }
 0x359   : > { %1548 = vmatpush.msk.msra.mxu0 %vm292_vm4, %v1041_v55  ;;  %1551 = vmatmul.msk.f32.vlgmr.msra.gmra.mxu1 %vm288_vm7, %v1547_v56 }
 0x35a   : > { %1555 = vmatpush.msk.msra.mxu3 %vm292_vm4, %v1837_v21  ;;  %1570 = vmatpush.msk.msra.mxu1 %vm292_vm4, %v858_v17  ;;  %v1211_v62 = vpop.permute.xlu0 %1210 }
 0x35b   : > { %1558 = vmatpush.msk.msrb.mxu0 %vm292_vm4, %v1039_v44  ;;  %v1205_v58 = vpop.permute.xlu1 %1204 }
 0x35c   : > { %v1208_v60 = vsel %vm235_vm8, %v1205_v58, %v1207_v57  ;;  %v1209_v1 = vsel %vm235_vm8, %v1207_v57, %v1205_v58 }
 0x35d   : > { %1565 = vmatpush.msk.msrb.mxu3 %vm292_vm4, %v1208_v60  ;;  %v924_v8 = vpop.f32.mrf.mxu3 }
 0x35e   : > { %1554 = vmatmul.msk.f32.vlgmr.msra.gmra.mxu2 %vm288_vm7, %v1552_v59  ;;  %v904_v12 = vpop.f32.mrf.mxu2 }
 0x360   : > { %1549 = vmatmul.msk.f32.vlgmr.msra.gmra.mxu0 %vm288_vm7, %v1547_v56  ;;  %1556 = vmatmul.msk.f32.vlgmr.msra.gmra.mxu3 %vm288_vm7, %v1552_v59 }
 0x361   : > { %1568 = vmatpush.msk.msra.mxu0 %vm292_vm4, %v857_v18  ;;  %1561 = vmatmul.msk.f32.vlgmr.msrb.gmra.mxu1 %vm288_vm7, %v1557_v61 }
 0x363   : > { %v1213_v63 = vpop.permute.xlu1 %1212 }
 0x364   : > { %v1214_v2 = vsel %vm278_vm9, %v1211_v62, %v1213_v63  ;;  %v1215_v3 = vsel %vm278_vm9, %v1213_v63, %v1211_v62 }
 0x365   : > { %v1216_v5 = vsel %vm235_vm8, %v1214_v2, %v1209_v1  ;;  %v1219_v6 = vsel %vm238_vm10, %v1208_v60, %v1215_v3 }
 0x366   : > { %1563 = vmatpush.msk.msrb.mxu2 %vm292_vm4, %v1216_v5  ;;  %1575 = vmatpush.msk.msra.mxu3 %vm292_vm4, %v1219_v6 }
 0x367   : > { %1564 = vmatmul.msk.f32.vlgmr.msrb.gmra.mxu2 %vm288_vm7, %v1562_v4 }
 0x368   : > { %1559 = vmatmul.msk.f32.vlgmr.msrb.gmra.mxu0 %vm288_vm7, %v1557_v61  ;;  %1566 = vmatmul.msk.f32.vlgmr.msrb.gmra.mxu3 %vm288_vm7, %v1562_v4 }
 0x369   : > { %1573 = vmatpush.msk.msra.mxu2 %vm292_vm4, %v1214_v2  ;;  %1571 = vmatmul.msk.f32.vlgmr.msra.gmra.mxu1 %vm288_vm7, %v1567_v7 }
 0x36f   : > { %1574 = vmatmul.msk.f32.vlgmr.msra.gmra.mxu2 %vm288_vm7, %v1572_v11 }
 0x370   : > { %1569 = vmatmul.msk.f32.vlgmr.msra.gmra.mxu0 %vm288_vm7, %v1567_v7  ;;  %1576 = vmatmul.msk.f32.vlgmr.msra.gmra.mxu3 %vm288_vm7, %v1572_v11 }
 0x3cb   : > { %v973_v9 = vpop.f32.mrf.mxu1 }
 0x3cc   : > { %v974_v20 = vadd.f32 %v973_v9, %v924_v8 }
 0x3d5   : > { %v953_v10 = vpop.f32.mrf.mxu0 }
 0x3d6   : > { %v1093_v15 = vpop.f32.mrf.mxu1  ;;  %v954_v19 = vadd.f32 %v953_v10, %v904_v12 }
 0x3d9   : > { %v1004_v13 = vpop.f32.mrf.mxu2 }
 0x3da   : > { %v1027_v21 = vadd.f32 %v1004_v13, %v954_v19 }
 0x3db   : > { %v1024_v14 = vpop.f32.mrf.mxu3 }
 0x3dc   : > { %v1028_v23 = vadd.f32 %v1024_v14, %v974_v20 }
 0x3dd   : > { %v1073_v16 = vpop.f32.mrf.mxu0 }
 0x3de   : > { %v1096_v25 = vadd.f32 %v1073_v16, %v1027_v21  ;;  %v1199_v29 = vpop.f32.mrf.mxu1  ;;  %v1097_v30 = vadd.f32 %v1093_v15, %v1028_v23 }
 0x3e1   : > { %v1126_v22 = vpop.f32.mrf.mxu2 }
 0x3e2   : > { %v1149_v31 = vadd.f32 %v1126_v22, %v1096_v25 }
 0x3e3   : > { %v1146_v24 = vpop.f32.mrf.mxu3 }
 0x3e4   : > { %v1150_v32 = vadd.f32 %v1146_v24, %v1097_v30 }
 0x3e5   : > { %v1179_v28 = vpop.f32.mrf.mxu0 }
 0x3e6   : > { %v1202_v17 = vadd.f32 %v1179_v28, %v1149_v31  ;;  %v1203_v34 = vadd.f32 %v1199_v29, %v1150_v32  ;;  %v1321_v36 = vpop.f32.mrf.mxu1 }
 0x3ea   : > { %v1248_v33 = vpop.f32.mrf.mxu2 }
 0x3eb   : > { %v1268_v18 = vpop.f32.mrf.mxu3  ;;  %v1271_v26 = vadd.f32 %v1248_v33, %v1202_v17 }
 0x3ec   : > { %v1272_v35 = vadd.f32 %v1268_v18, %v1203_v34 }
 0x3ed   : > { %v1301_v27 = vpop.f32.mrf.mxu0 }
 0x3ee   : > { %v1324_v37 = vadd.f32 %v1301_v27, %v1271_v26  ;;  %v1325_v38 = vadd.f32 %v1321_v36, %v1272_v35 }
 0x3f2   : > { %v1354_v39 = vpop.f32.mrf.mxu2 }
 0x3f3   : > { %v1377_v41 = vadd.f32 %v1354_v39, %v1324_v37  ;;  %v1374_v42 = vpop.f32.mrf.mxu3 }
 0x3f4   : > { %v1378_v43 = vadd.f32 %v1374_v42, %v1325_v38 }
 0x3f5   : > { %v1385_v44 = vadd.f32 %v1383_v40, %v1377_v41 }
 0x3f6   : > { %v1386_v45 = vadd.f32 %v1383_v40, %v1378_v43 }
 0x3f7   : > { %v1387_v46 = vsel %vm292_vm4, %v1385_v44, 0.0  ;;  %v1393_v47 = vmul.f32 %v1385_v44, %v1385_v44 }
 0x3f8   : > { %v1388_v48 = vsel %vm292_vm4, %v1386_v45, 0.0  ;;  %v1394_v49 = vmul.f32 %v1386_v45, %v1386_v45 }
 0x3f9   : > { %v1389_v50 = vadd.f32 %v1388_v48, %v1387_v46  ;;  %v1395_v51 = vsel %vm292_vm4, %v1393_v47, 0.0 }
 0x3fa   : > { %v1396_v52 = vsel %vm292_vm4, %v1394_v49, 0.0 }
 0x3fb   : > { %1390 = vadd.xlane.f32.xlu0 %v1389_v50  ;;  %v1397_v53 = vadd.f32 %v1396_v52, %v1395_v51 }
 0x3fd   : > { %1398 = vadd.xlane.f32.xlu1 %v1397_v53 }
 0x46e   : > { %v1391_v54 = vpop.xlane.xlu0 %1390 }
 0x46f   : > { %v1392_v55 = vmul.f32 0.00390625, %v1391_v54 }
 0x470   : > { %v1399_v56 = vpop.xlane.xlu1 %1398 }
 0x471   : > { %v1400_v57 = vmul.f32 0.00390625, %v1399_v56  ;;  %v1401_v58 = vmul.f32 %v1392_v55, %v1392_v55  ;;  %v1404_v4 = vsub.f32 %v1386_v45, %v1392_v55  ;;  %v1403_v6 = vsub.f32 %v1385_v44, %v1392_v55 }
 0x473   : > { %v1402_v59 = vsub.f32 %v1400_v57, %v1401_v58 }
 0x475   : > { %v1405_v60 = vadd.f32 1e-05, %v1402_v59 }
 0x477   : > { %1599 = vrsqrt.f32 %v1405_v60  ;;  %vm1412_vm15 = vweird.f32 %v1405_v60 }
 0x47d   : > { %v1600_v61 = vpop.eup %1599 }
 0x47e   : > { %v1407_v62 = vmul.f32 %v1600_v61, %v1405_v60  ;;  %vm1413_vm14 = vweird.f32 %v1600_v61 }
 0x47f   : > { %vm1414_vm0 = vmor %vm1412_vm15, %vm1413_vm14 }
 0x480   : > { %v1408_v63 = vmul.f32 %v1600_v61, %v1407_v62 }
 0x482   : > { %v1409_v1 = vmul.f32 0.5, %v1408_v63 }
 0x484   : > { %v1410_v2 = vsub.f32 1.5, %v1409_v1 }
 0x486   : > { %v1411_v3 = vmul.f32 %v1600_v61, %v1410_v2 }
 0x488   : > { %v1415_v5 = vsel %vm1414_vm0, %v1600_v61, %v1411_v3 }
 0x489   : > { %v1417_v7 = vmul.f32 %v1415_v5, %v1404_v4  ;;  %v1416_v11 = vmul.f32 %v1415_v5, %v1403_v6 }
 0x48b   : > { %v1420_v12 = vrot.slane %v1417_v7, 4 }
 0x48d   : > { %v1421_v8 = vsel %vm292_vm4, %v1416_v11, %v1420_v12 }
 0x48e   : > { %v1423_v9 = vadd.f32 %v1421_v8, %v1660_v0 }
 0x490   : > { %1424 = vst [vmem:[%s224_s24] sm:$0xff] %v1423_v9 }
 0x491 PF: > { %s15_s18 = sadd.s32 1, %s1607_s18  }
 0x492   : > { %p12_p4 = scmp.ge.s32.totalorder %s15_s18, 4  }
 0x494   :  { %14 = sbr.rel (!%p12_p4) target bundleno = 1 (0x1), region = 86 }

</bundles_post_ra>
